<compile_context>
chip_gen: v5e
topology: v5e:2x2
jax: 0.10.0
libtpu: 0.0.40
codegen_flags: <defaults>
</compile_context>

<pallas_src>
import functools

import jax
import jax.numpy as jnp
from jax.experimental import pallas as pl
from jax.experimental.pallas import tpu as pltpu


_SOFTPLUS_THRESHOLD = 20.0


def _softplus_f32(sig_raw):
    # PyTorch F.softplus(x, beta=1, threshold=20): exact passthrough for x > 20,
    # log1p(exp(x)) otherwise; the minimum() keeps exp() from overflowing.
    x32 = sig_raw.astype(jnp.float32)
    safe = jnp.minimum(x32, _SOFTPLUS_THRESHOLD)
    sp = jnp.log1p(jnp.exp(safe))
    return jnp.where(x32 > _SOFTPLUS_THRESHOLD, x32, sp)


def _split_kernel(mu_in_ref, sig_in_ref, mu_ref, sigma_ref):
    # mu half: pure ref-to-ref copy (already its own rectangular DMA tile).
    mu_ref[...] = mu_in_ref[...]
    # sigma half: softplus in f32, cast back at the (lane-dense) store.
    sigma_ref[...] = _softplus_f32(sig_in_ref[...]).astype(sigma_ref.dtype)


def _fused_kernel(x_ref, out_ref, *, half_dim):
    # Fallback when D % 128 != 0: keep the store lane-dense by writing a single
    # full-width (block_b, 2D) tile [mu | softplus(sigma)].
    x = x_ref[...]
    mu = x[:, :half_dim]
    sigma = _softplus_f32(x[:, half_dim:]).astype(out_ref.dtype)
    out_ref[...] = jnp.concatenate([mu, sigma], axis=-1)


def _choose_block_b(B, D, itemsize):
    """Rows per grid step: a multiple of 8 that divides B, leaves >= 2 grid
    steps when possible, and keeps the double-buffered per-step working set
    around ~8 MiB (in: 2D + out: 2D per row, x2 for double buffering)."""
    if B <= 8 or B % 8 != 0:
        return B
    per_row_bytes = 8 * max(D, 1) * itemsize
    budget_rows = max(8, (8 * 1024 * 1024) // per_row_bytes)
    cap = min(B // 2, budget_rows, 4096)
    if cap < 8:
        return B
    best = 8
    bb = 8
    while bb <= cap:
        if B % bb == 0:
            best = bb
        bb += 8
    return best


def flat_gaussian(x, *, block_b=None, use_pallas=None):
    """Returns (mu, sigma): the parameters of Normal(mu, sigma) in FlatGaussian."""
    assert x.ndim == 2
    B, F2 = x.shape
    assert F2 % 2 == 0
    D = F2 // 2
    itemsize = jnp.dtype(x.dtype).itemsize

    # Tiny op: fixed pallas_call launch overhead dominates; let XLA fuse it.
    if use_pallas is None:
        use_pallas = (B * F2) >= 16384
    if not use_pallas:
        return x[:, :D], _softplus_f32(x[:, D:]).astype(x.dtype)

    if block_b is None:
        block_b = _choose_block_b(B, D, itemsize)
    assert B % block_b == 0
    grid = (B // block_b,)

    cost = pl.CostEstimate(
        flops=0,
        transcendentals=2 * B * D,                 # exp + log1p per sigma element
        bytes_accessed=4 * B * D * itemsize,       # read 2*B*D, write 2*B*D
    )
    cparams = pltpu.CompilerParams(dimension_semantics=("parallel",))

    if D % 128 == 0:
        # Main path: x passed twice, each half fetched as its own tile.
        mu, sigma = pl.pallas_call(
            _split_kernel,
            out_shape=(
                jax.ShapeDtypeStruct((B, D), x.dtype),
                jax.ShapeDtypeStruct((B, D), x.dtype),
            ),
            grid_spec=pltpu.PrefetchScalarGridSpec(
                num_scalar_prefetch=0,
                grid=grid,
                in_specs=[
                    pl.BlockSpec((block_b, D), lambda i: (i, 0)),  # mu half
                    pl.BlockSpec((block_b, D), lambda i: (i, 1)),  # sigma half
                ],
                out_specs=[
                    pl.BlockSpec((block_b, D), lambda i: (i, 0)),
                    pl.BlockSpec((block_b, D), lambda i: (i, 0)),
                ],
            ),
            compiler_params=cparams,
            cost_estimate=cost,
        )(x, x)
        return mu, sigma

    # Fallback: D is not a multiple of 128 -> single lane-dense (B, 2D) output,
    # split in the wrapper (avoids masked vst on narrow outputs).
    out = pl.pallas_call(
        functools.partial(_fused_kernel, half_dim=D),
        out_shape=jax.ShapeDtypeStruct((B, F2), x.dtype),
        grid_spec=pltpu.PrefetchScalarGridSpec(
            num_scalar_prefetch=0,
            grid=grid,
            in_specs=[pl.BlockSpec((block_b, F2), lambda i: (i, 0))],
            out_specs=pl.BlockSpec((block_b, F2), lambda i: (i, 0)),
        ),
        compiler_params=cparams,
        cost_estimate=cost,
    )(x)
    return out[:, :D], out[:, D:]


def _reference(x, D):
    mu_ref = x[:, :D]
    sr = x[:, D:]
    sigma_ref = jnp.where(
        sr > _SOFTPLUS_THRESHOLD,
        sr,
        jnp.log1p(jnp.exp(jnp.minimum(sr, _SOFTPLUS_THRESHOLD))),
    )
    return mu_ref, sigma_ref


if __name__ == "__main__":
    key = jax.random.PRNGKey(0)

    # --- Main path: D is a multiple of 128, grid has 2 "parallel" steps. ---
    B, D = 512, 128                      # x: (512, 256) -> block_b = 256, grid=(2,)
    x = jax.random.normal(key, (B, 2 * D), dtype=jnp.float32) * 5.0
    # Exercise the softplus threshold / passthrough branches explicitly.
    x = x.at[0, D:D + 4].set(jnp.array([25.0, -25.0, 20.0, 0.0], dtype=jnp.float32))

    mu, sigma = flat_gaussian(x)
    jax.block_until_ready((mu, sigma))

    mu_ref, sigma_ref = _reference(x, D)
    assert jnp.allclose(mu, mu_ref, atol=1e-6)
    assert jnp.allclose(sigma, sigma_ref, atol=1e-5)
    assert bool(jnp.all(sigma > 0.0))

    # --- Fallback path: D not a multiple of 128 (lane-dense fused output). ---
    B2, D2 = 64, 64                      # x: (64, 128), full-width blocks
    x2 = jax.random.normal(jax.random.PRNGKey(1), (B2, 2 * D2), dtype=jnp.float32) * 5.0
    mu2, sigma2 = flat_gaussian(x2, use_pallas=True)
    jax.block_until_ready((mu2, sigma2))

    mu2_ref, sigma2_ref = _reference(x2, D2)
    assert jnp.allclose(mu2, mu2_ref, atol=1e-6)
    assert jnp.allclose(sigma2, sigma2_ref, atol=1e-5)
    assert bool(jnp.all(sigma2 > 0.0))

    print("KERNEL_OK")
</pallas_src>

<mosaic_0001>
module attributes {stable_mosaic.version = 11 : i64} {
  func.func @_split_kernel(%arg0: i32, %arg1: memref<256x128xf32, #tpu.memory_space<vmem>>, %arg2: memref<256x128xf32, #tpu.memory_space<vmem>>, %arg3: memref<256x128xf32, #tpu.memory_space<vmem>>, %arg4: memref<256x128xf32, #tpu.memory_space<vmem>>) attributes {dimension_semantics = [#tpu.dimension_semantics<parallel>], iteration_bounds = array<i64: 2>, scalar_prefetch = 0 : i64, scratch_operands = 0 : i64, tpu.core_type = #tpu.core_type<tc>, window_params = [{transform_indices = @transform_0, window_bounds = array<i64: 256, 128>}, {transform_indices = @transform_1, window_bounds = array<i64: 256, 128>}, {transform_indices = @transform_2, window_bounds = array<i64: 256, 128>}, {transform_indices = @transform_3, window_bounds = array<i64: 256, 128>}]} {
    %c0 = arith.constant 0 : index
    %c0_0 = arith.constant 0 : index
    %0 = vector.load %arg1[%c0, %c0_0] : memref<256x128xf32, #tpu.memory_space<vmem>>, vector<256x128xf32>
    %c0_1 = arith.constant 0 : index
    %c0_2 = arith.constant 0 : index
    %1 = vector.load %arg3[%c0_1, %c0_2] : memref<256x128xf32, #tpu.memory_space<vmem>>, vector<256x128xf32>
    tpu.vector_store %arg3[%c0_1, %c0_2], %0 {strides = array<i32>} : memref<256x128xf32, #tpu.memory_space<vmem>>, vector<256x128xf32>,
    %c0_3 = arith.constant 0 : index
    %c0_4 = arith.constant 0 : index
    %2 = vector.load %arg2[%c0_3, %c0_4] : memref<256x128xf32, #tpu.memory_space<vmem>>, vector<256x128xf32>
    %cst = arith.constant 2.000000e+01 : f32
    %3 = vector.broadcast %cst : f32 to vector<256x128xf32>
    %4 = arith.minimumf %2, %3 : vector<256x128xf32>
    %5 = math.exp %4 : vector<256x128xf32>
    %6 = math.log1p %5 : vector<256x128xf32>
    %cst_5 = arith.constant 2.000000e+01 : f32
    %7 = vector.broadcast %cst_5 : f32 to vector<256x128xf32>
    %8 = arith.cmpf ogt, %2, %7 : vector<256x128xf32>
    %9 = arith.select %8, %2, %6 : vector<256x128xi1>, vector<256x128xf32>
    %c0_6 = arith.constant 0 : index
    %c0_7 = arith.constant 0 : index
    %10 = vector.load %arg4[%c0_6, %c0_7] : memref<256x128xf32, #tpu.memory_space<vmem>>, vector<256x128xf32>
    tpu.vector_store %arg4[%c0_6, %c0_7], %9 {strides = array<i32>} : memref<256x128xf32, #tpu.memory_space<vmem>>, vector<256x128xf32>,
    return
  }
  func.func @transform_0(%arg0: i32) -> (i32, i32) {
    %c0_i32 = arith.constant 0 : i32
    %c0_i32_0 = arith.constant 0 : i32
    return %arg0, %c0_i32 : i32, i32
  }
  func.func @transform_1(%arg0: i32) -> (i32, i32) {
    %c1_i32 = arith.constant 1 : i32
    %c0_i32 = arith.constant 0 : i32
    return %arg0, %c1_i32 : i32, i32
  }
  func.func @transform_2(%arg0: i32) -> (i32, i32) {
    %c0_i32 = arith.constant 0 : i32
    %c0_i32_0 = arith.constant 0 : i32
    return %arg0, %c0_i32 : i32, i32
  }
  func.func @transform_3(%arg0: i32) -> (i32, i32) {
    %c0_i32 = arith.constant 0 : i32
    %c0_i32_0 = arith.constant 0 : i32
    return %arg0, %c0_i32 : i32, i32
  }
}

</mosaic_0001>

<bundles_post_ra>
// kernel: tpu_custom_call.1
= control target key start
LH: loop header
LB: loop body
LE: loop exit
PB: predicated region body
PF: predicated region fallthrough
CT: control target
= control target key end

     0   :  { %s2202_s0 = inlined_call_operand.hbm [shape: f32[512,256], index: 0, kind: input, shape index: {}]   ;;  %s2203_s1 = inlined_call_operand.hbm [shape: f32[512,256], index: 1, kind: input, shape index: {}]   ;;  %s2204_s2 = inlined_call_operand.hbm [shape: f32[512,128], index: 2, kind: output, shape index: {0}]   ;;  %s2205_s3 = inlined_call_operand.hbm [shape: f32[512,128], index: 3, kind: output, shape index: {1}]  }
   0x1   :  { %2206 = sst [smem:[#allocation15_spill]] %s2202_s0 }
   0x2   :  { %9 = vsyncpa [#allocation3], 0 }
   0x3   :  { %11 = vsyncpa [#allocation3 + $0x1], 0 }
   0x4   :  { %12 = vsyncpa [#allocation6], 0 }
   0x5   :  { %14 = vsyncpa [#allocation6 + $0x1], 0 }
   0x6   :  { %15 = vsyncpa [#allocation4], 0 }
   0x7   :  { %17 = vsyncpa [#allocation4 + $0x1], 0 }
   0x8   :  { %18 = vsyncpa [#allocation9], 0 }
   0x9   :  { %20 = vsyncpa [#allocation9 + $0x1], 0  ;;  %s1402_s12 = smov 0   ;;  %s1404_s13 = smov 0  }
   0xa   :  { %s1406_s14 = smov 0   ;;  %s1408_s15 = smov 0  }
   0xb LB: > { %s1423_s16 = sadd.s32 4294967295, %s1375_s15   ;;  %s996_s17 = sadd.s32 4294967294, %s1375_s15   ;;  %s1375_s15 = sphi %s1408_s15, %s2279_s15   ;;  %s1371_s14 = sphi %s1406_s14, %s2278_s14   ;;  %s1367_s13 = sphi %s1404_s13, %s2277_s13   ;;  %s1363_s12 = sphi %s1402_s12, %s2276_s12  }
   0xc   : > { %s1427_s18 = sadd.s32 1, %s1375_s15   ;;  %s33_s19 = sadd.s32 1, %s1371_s14 }
   0xd   : > { %s30_s20 = ssub.s32 %s1375_s15, %s1427_s18  ;;  %p40_p0 = scmp.ne.s32.totalorder %s1371_s14, %s1367_s13 }
   0xe   : > { %p31_p1 = scmp.eq.s32.totalorder %s30_s20, 0  ;;  %p41_p2 = scmp.eq.s32.totalorder %s1375_s15, 0 }
   0xf   : > { %p46_p3 = scmp.ne.s32.totalorder %s1367_s13, %s1363_s12  ;;  %p47_p4 = scmp.eq.s32.totalorder %s1423_s16, 0 }
  0x10   : > { %s1439_s21 = scalar_select %p31_p1, %s1371_s14, %s33_s19  }
  0x11   : > { %p1441_p5 = por %p41_p2, %p40_p0  ;;  %p1445_p6 = por %p47_p4, %p46_p3 }
  0x12   : > { %2207 = sst [smem:[#allocation14_spill]] %s1439_s21  ;;  %p96_p7 = scmp.eq.s32.totalorder %s1423_s16, 1 }
  0x13   : > { %p102_p8 = scmp.eq.s32.totalorder %s996_s17, 1  ;;  %p998_p9 = scmp.ge.s32.totalorder %s1375_s15, 2 }
  0x14   : > { %p1046_p10 = scmp.lt.s32.totalorder %s1375_s15, 2  ;;  %p1452_p11 = por %p96_p7, %p40_p0 }
  0x15   : > { %p1456_p12 = por %p102_p8, %p46_p3  ;;  %s1461_s26 = sand.u32 1, %s1371_s14  }
  0x16   : > { %s1020_s27 = sshll.u32 %s1375_s15, 9  ;;  %s999_s28 = sshll.u32 %s1461_s26, 8 }
  0x17   : > { %s2212_s0 = sld [smem:[#allocation15_spill]]  ;;  %s152_s6 = scalar_lea.vmem [#allocation2], %s999_s28 }
  0x18   : > { %s161_s7 = sshll.u32 %s152_s6, 4  ;;  %p1474_p13 = pnand %p1046_p10, %p1441_p5  ;;  %s162_s7 = int_to_ptr.vmem [resolvable:$true] %s161_s7 }
  0x19   : > { %p1006_p0 = scmp.ge.s32.totalorder %s1375_s15, 1  ;;  %s149_s9 = scalar_lea.sflag [#allocation3], %s1461_s26 }
  0x1a   : > { %p1217_p2 = pneg %p1474_p13 }
  0x1d   : > { %s158_s4 = scalar_lea.hbm %s2212_s0, %s1020_s27  ;;  %s1220_s20 = scalar_lea.hbm %s2212_s0, 1024 }
  0x1e   : > { %s159_s5 = sshll.u32 %s158_s4, 4  ;;  %s160_s5 = int_to_ptr.hbm [resolvable:$true] %s159_s5 }
  0x1f   : > { %s1213_s10 = sshra.s32 %s160_s5, 4  ;;  %s1214_s10 = int_to_ptr.hbm [resolvable:$true] %s1213_s10 }
  0x20   : > { %s1215_s11 = scalar_lea.hbm %s1214_s10, 256  ;;  %p1221_p5 = scmp.lt.s32.totalorder %s1214_s10, %s2212_s0 }
  0x21   : > { %p1216_p1 = scmp.ne.s32.totalorder %s1214_s10, %s1215_s11  ;;  %p1222_p7 = scmp.lt.s32.totalorder %s1220_s20, %s1215_s11 }
  0x23   : > { %p1218_p3 = pnand %p1217_p2, %p1216_p1  ;;  %p1223_p8 = por %p1222_p7, %p1221_p5 }
  0x25   : > { %p1219_p4 = pneg %p1218_p3 }
  0x27   : > { %p1224_p10 = pnand %p1223_p8, %p1219_p4 }
  0x29   : > { %1227 = shalt.err (!%p1224_p10)
}
  0x2a   : > { %s1377_s30 = smov 256   ;;  %s1378_s4 = smov 128  }
  0x2b   : > { %s1379_s6 = smov 8   ;;  %p193_p1 = scmp.lt.s32.totalorder %s1375_s15, 3 }
  0x2c   : > { %1035 = dma.hbm_to_vmem [thread:$0]  (!%p1474_p13), %s160_s5, 4096, %s162_s7, %s149_s9, %s1377_s30, %s1378_s4, %s1379_s6  }
  0x2d   : > { %s918_s17 = scalar_lea.hbm %s2203_s1, %s1020_s27  ;;  %p1503_p3 = pnand %p1006_p0, %p193_p1 }
  0x2e   : > { %s919_s20 = scalar_lea.hbm %s918_s17, 8  ;;  %s175_s29 = scalar_lea.vmem [#allocation5], %s999_s28 }
  0x2f   : > { %s183_s22 = sshll.u32 %s919_s20, 4  ;;  %s185_s0 = sshll.u32 %s175_s29, 4  ;;  %s184_s22 = int_to_ptr.hbm [resolvable:$true] %s183_s22  ;;  %s186_s0 = int_to_ptr.vmem [resolvable:$true] %s185_s0 }
  0x30   : > { %s172_s21 = scalar_lea.sflag [#allocation6], %s1461_s26  ;;  %s1243_s5 = sshra.s32 %s184_s22, 4  ;;  %s1244_s5 = int_to_ptr.hbm [resolvable:$true] %s1243_s5 }
  0x31   : > { %s1245_s7 = scalar_lea.hbm %s1244_s5, 256  ;;  %s1250_s10 = scalar_lea.hbm %s2203_s1, 1024 }
  0x32   : > { %p1246_p4 = scmp.ne.s32.totalorder %s1244_s5, %s1245_s7  ;;  %p1251_p0 = scmp.lt.s32.totalorder %s1244_s5, %s2203_s1 }
  0x33   : > { %p1252_p8 = scmp.lt.s32.totalorder %s1250_s10, %s1245_s7 }
  0x34   : > { %p1248_p5 = pnand %p1246_p4, %p1217_p2 }
  0x35   : > { %p1253_p10 = por %p1252_p8, %p1251_p0 }
  0x36   : > { %p1249_p7 = pneg %p1248_p5 }
  0x38   : > { %p1254_p1 = pnand %p1253_p10, %p1249_p7 }
  0x3a   : > { %1257 = shalt.err (!%p1254_p1)
}
  0x3b   : > { %1038 = dma.hbm_to_vmem [thread:$0]  (!%p1474_p13), %s184_s22, 4096, %s186_s0, %s172_s21, %s1377_s30, %s1378_s4, %s1379_s6  }
  0x3c   : > { %197 = sbr.rel (%p1503_p3) target bundleno = 209 (0xd1), region = 28  ;;  %s1526_s26 = sand.u32 (!%p1503_p3), 1, %s1367_s13  }
  0x3d   : > { %s1529_s28 = sshll.u32 (!%p1503_p3), %s1526_s26, 8  ;;  %s200_s20 = scalar_lea.sflag (!%p1503_p3), [#allocation3], %s1526_s26 }
  0x3e   : > { %s1533_s29 = scalar_lea.vmem (!%p1503_p3), [#allocation2], %s1529_s28 }
  0x41   : > { %1346 = dma.done.wait (%p1445_p6), %s200_s20, 4096  }
  0x42   : > { %1348 = vsyncadd (%p1445_p6), %s200_s20, 4294963200  ;;  %s210_s0 = scalar_lea.sflag [#allocation6], %s1526_s26  ;;  %s1541_s21 = scalar_lea.vmem [#allocation5], %s1529_s28 }
  0x43   : > { %1350 = dma.done.wait (%p1445_p6), %s210_s0, 4096  }
  0x44   : > { %1352 = vsyncadd (%p1445_p6), %s210_s0, 4294963200  ;;  %v251_v0 = vld [vmem:[%s1533_s29] sm:$0xff]  ;;  %v252_v1 = vld [vmem:[%s1533_s29 + $0x8] sm:$0xff]  ;;  %s1551_s8 = scalar_lea.vmem [#allocation7], %s1529_s28  ;;  %s1022_s23 = sshll.u32 %s1423_s16, 8 }
  0x45   : > { %v253_v2 = vld [vmem:[%s1533_s29 + $0x10] sm:$0xff]  ;;  %283 = vst [vmem:[%s1551_s8] sm:$0xff] %v251_v0  ;;  %v254_v3 = vld [vmem:[%s1533_s29 + $0x18] sm:$0xff]  ;;  %v255_v4 = vld [vmem:[%s1533_s29 + $0x20] sm:$0xff]  ;;  %s1668_s6 = scalar_lea.hbm %s2204_s2, %s1022_s23  ;;  %s845_s19 = sshll.u32 %s1551_s8, 4  ;;  %s1711_s19 = int_to_ptr.vmem [resolvable:$true] %s845_s19 }
  0x46   : > { %284 = vst [vmem:[%s1551_s8 + $0x8] sm:$0xff] %v252_v1  ;;  %v256_v5 = vld [vmem:[%s1533_s29 + $0x28] sm:$0xff]  ;;  %v257_v6 = vld [vmem:[%s1533_s29 + $0x30] sm:$0xff]  ;;  %v258_v7 = vld [vmem:[%s1533_s29 + $0x38] sm:$0xff]  ;;  %s847_s22 = sshll.u32 %s1668_s6, 4  ;;  %s828_s5 = scalar_lea.sflag [#allocation4], %s1526_s26  ;;  %s1713_s22 = int_to_ptr.hbm [resolvable:$true] %s847_s22 }
  0x47   : > { %285 = vst [vmem:[%s1551_s8 + $0x10] sm:$0xff] %v253_v2  ;;  %v259_v8 = vld [vmem:[%s1533_s29 + $0x40] sm:$0xff]  ;;  %v260_v9 = vld [vmem:[%s1533_s29 + $0x48] sm:$0xff]  ;;  %v261_v10 = vld [vmem:[%s1533_s29 + $0x50] sm:$0xff]  ;;  %s1287_s7 = sshra.s32 %s1713_s22, 4  ;;  %s1293_s11 = scalar_lea.hbm %s2204_s2, 512  ;;  %s1288_s7 = int_to_ptr.hbm [resolvable:$true] %s1287_s7 }
  0x48   : > { %286 = vst [vmem:[%s1551_s8 + $0x18] sm:$0xff] %v254_v3  ;;  %v262_v11 = vld [vmem:[%s1533_s29 + $0x58] sm:$0xff]  ;;  %v263_v12 = vld [vmem:[%s1533_s29 + $0x60] sm:$0xff]  ;;  %v264_v13 = vld [vmem:[%s1533_s29 + $0x68] sm:$0xff]  ;;  %s1289_s27 = scalar_lea.hbm %s1288_s7, 256  ;;  %p1294_p3 = scmp.lt.s32.totalorder %s1288_s7, %s2204_s2 }
  0x49   : > { %287 = vst [vmem:[%s1551_s8 + $0x20] sm:$0xff] %v255_v4  ;;  %v265_v14 = vld [vmem:[%s1533_s29 + $0x70] sm:$0xff]  ;;  %v1576_v15 = vld [vmem:[%s1541_s21] sm:$0xff]  ;;  %v1581_v17 = vld [vmem:[%s1541_s21 + $0x8] sm:$0xff]  ;;  %p1290_p6 = scmp.ne.s32.totalorder %s1288_s7, %s1289_s27  ;;  %p1295_p4 = scmp.lt.s32.totalorder %s1293_s11, %s1289_s27 }
  0x4a   : > { %288 = vst [vmem:[%s1551_s8 + $0x28] sm:$0xff] %v256_v5  ;;  %v347_v16 = vmin.f32 %v1576_v15, 20.0  ;;  %v1584_v18 = vld [vmem:[%s1541_s21 + $0x10] sm:$0xff]  ;;  %v1587_v19 = vld [vmem:[%s1541_s21 + $0x18] sm:$0xff]  ;;  %v267_v21 = vld [vmem:[%s1533_s29 + $0x80] sm:$0xff]  ;;  %v348_v22 = vmin.f32 %v1581_v17, 20.0 }
  0x4b   : > { %289 = vst [vmem:[%s1551_s8 + $0x30] sm:$0xff] %v257_v6  ;;  %v266_v20 = vld [vmem:[%s1533_s29 + $0x78] sm:$0xff]  ;;  %v349_v23 = vmin.f32 %v1584_v18, 20.0  ;;  %v1595_v24 = vld [vmem:[%s1541_s21 + $0x20] sm:$0xff]  ;;  %v268_v25 = vld [vmem:[%s1533_s29 + $0x88] sm:$0xff]  ;;  %v350_v27 = vmin.f32 %v1587_v19, 20.0  ;;  %p1291_p13 = pnand %p1290_p6, %p1452_p11  ;;  %p1296_p5 = por %p1295_p4, %p1294_p3 }
  0x4c   : > { %290 = vst [vmem:[%s1551_s8 + $0x38] sm:$0xff] %v258_v7  ;;  %v379_v26 = vmul.f32 1.442695, %v347_v16  ;;  %v351_v28 = vmin.f32 %v1595_v24, 20.0  ;;  %v269_v29 = vld [vmem:[%s1533_s29 + $0x90] sm:$0xff]  ;;  %v1605_v34 = vld [vmem:[%s1541_s21 + $0x28] sm:$0xff] }
  0x4d   : > { %291 = vst [vmem:[%s1551_s8 + $0x40] sm:$0xff] %v259_v8  ;;  %v381_v30 = vmul.f32 1.442695, %v348_v22  ;;  %v383_v31 = vmul.f32 1.442695, %v349_v23  ;;  %v352_v35 = vmin.f32 %v1605_v34, 20.0  ;;  %p1292_p2 = pneg %p1291_p13 }
  0x4e   : > { %292 = vst [vmem:[%s1551_s8 + $0x48] sm:$0xff] %v260_v9  ;;  %1085 = vpow2.f32 %v379_v26  ;;  %v385_v32 = vmul.f32 1.442695, %v350_v27  ;;  %v387_v33 = vmul.f32 1.442695, %v351_v28  ;;  %v1610_v36 = vld [vmem:[%s1541_s21 + $0x30] sm:$0xff] }
  0x4f   : > { %293 = vst [vmem:[%s1551_s8 + $0x50] sm:$0xff] %v261_v10  ;;  %1087 = vpow2.f32 %v381_v30  ;;  %v1613_v37 = vld [vmem:[%s1541_s21 + $0x38] sm:$0xff]  ;;  %v1616_v38 = vld [vmem:[%s1541_s21 + $0x40] sm:$0xff]  ;;  %v353_v41 = vmin.f32 %v1610_v36, 20.0  ;;  %v389_v43 = vmul.f32 1.442695, %v352_v35  ;;  %p1297_p7 = pnand %p1296_p5, %p1292_p2 }
  0x50   : > { %294 = vst [vmem:[%s1551_s8 + $0x58] sm:$0xff] %v262_v11  ;;  %v270_v39 = vld [vmem:[%s1533_s29 + $0x98] sm:$0xff]  ;;  %v271_v40 = vld [vmem:[%s1533_s29 + $0xa0] sm:$0xff]  ;;  %1089 = vpow2.f32 %v383_v31  ;;  %v354_v42 = vmin.f32 %v1613_v37, 20.0  ;;  %v355_v44 = vmin.f32 %v1616_v38, 20.0  ;;  %v1626_v45 = vld [vmem:[%s1541_s21 + $0x48] sm:$0xff] }
  0x51   : > { %295 = vst [vmem:[%s1551_s8 + $0x60] sm:$0xff] %v263_v12  ;;  %1091 = vpow2.f32 %v385_v32  ;;  %v1629_v46 = vld [vmem:[%s1541_s21 + $0x50] sm:$0xff]  ;;  %v272_v47 = vld [vmem:[%s1533_s29 + $0xa8] sm:$0xff]  ;;  %v391_v48 = vmul.f32 1.442695, %v353_v41  ;;  %v274_v51 = vld [vmem:[%s1533_s29 + $0xb8] sm:$0xff] }
  0x52   : > { %296 = vst [vmem:[%s1551_s8 + $0x68] sm:$0xff] %v264_v13  ;;  %1093 = vpow2.f32 %v387_v33  ;;  %v393_v49 = vmul.f32 1.442695, %v354_v42  ;;  %v273_v50 = vld [vmem:[%s1533_s29 + $0xb0] sm:$0xff]  ;;  %v395_v52 = vmul.f32 1.442695, %v355_v44 }
  0x53   : > { %297 = vst [vmem:[%s1551_s8 + $0x70] sm:$0xff] %v265_v14  ;;  %1095 = vpow2.f32 %v389_v43  ;;  %v275_v54 = vld [vmem:[%s1533_s29 + $0xc0] sm:$0xff]  ;;  %v276_v55 = vld [vmem:[%s1533_s29 + $0xc8] sm:$0xff]  ;;  %v356_v56 = vmin.f32 %v1626_v45, 20.0  ;;  %v357_v57 = vmin.f32 %v1629_v46, 20.0  ;;  %v1642_v58 = vld [vmem:[%s1541_s21 + $0x58] sm:$0xff] }
  0x54   : > { %298 = vst [vmem:[%s1551_s8 + $0x78] sm:$0xff] %v266_v20  ;;  %v1086_v53 = vpop.eup %1085  ;;  %1097 = vpow2.f32 %v391_v48  ;;  %v277_v0 = vld [vmem:[%s1533_s29 + $0xd0] sm:$0xff]  ;;  %vm731_vm0 = vcmp.gt.f32.partialorder %v1576_v15, 20.0  ;;  %v278_v5 = vld [vmem:[%s1533_s29 + $0xd8] sm:$0xff]  ;;  %v279_v6 = vld [vmem:[%s1533_s29 + $0xe0] sm:$0xff]  ;;  %vm732_vm1 = vcmp.gt.f32.partialorder %v1581_v17, 20.0 }
  0x55   : > { %299 = vst [vmem:[%s1551_s8 + $0x80] sm:$0xff] %v267_v21  ;;  %v1088_v59 = vpop.eup %1087  ;;  %v443_v60 = vadd.f32 1.0, %v1086_v53  ;;  %v446_v61 = vmul.f32 -0.5, %v1086_v53  ;;  %v449_v62 = vand.u32 2147483647, %v1086_v53  ;;  %1099 = vpow2.f32 %v393_v49  ;;  %v280_v11 = vld [vmem:[%s1533_s29 + $0xe8] sm:$0xff] }
  0x56   : > { %300 = vst [vmem:[%s1551_s8 + $0x88] sm:$0xff] %v268_v25  ;;  %v1090_v63 = vpop.eup %1089  ;;  %v452_v1 = vadd.f32 1.0, %v1088_v59  ;;  %v455_v2 = vmul.f32 -0.5, %v1088_v59  ;;  %v458_v3 = vand.u32 2147483647, %v1088_v59  ;;  %1101 = vpow2.f32 %v395_v52  ;;  %v281_v20 = vld [vmem:[%s1533_s29 + $0xf0] sm:$0xff] }
  0x57   : > { %301 = vst [vmem:[%s1551_s8 + $0x90] sm:$0xff] %v269_v29  ;;  %v1092_v4 = vpop.eup %1091  ;;  %1103 = vlog2.f32 %v443_v60  ;;  %v447_v7 = vadd.f32 1.0, %v446_v61  ;;  %v461_v8 = vadd.f32 1.0, %v1090_v63  ;;  %v358_v9 = vmin.f32 %v1642_v58, 20.0  ;;  %v282_v31 = vld [vmem:[%s1533_s29 + $0xf8] sm:$0xff] }
  0x58   : > { %302 = vst [vmem:[%s1551_s8 + $0x98] sm:$0xff] %v270_v39  ;;  %v1654_v10 = vpop.eup %1093  ;;  %vm1658_vm2 = vcmp.lt.f32.partialorder %v449_v62, 0.0004427343  ;;  %1105 = vlog2.f32 %v452_v1  ;;  %v456_v13 = vadd.f32 1.0, %v455_v2  ;;  %v464_v14 = vmul.f32 -0.5, %v1090_v63 }
  0x59   : > { %303 = vst [vmem:[%s1551_s8 + $0xa0] sm:$0xff] %v271_v40  ;;  %vm733_vm3 = vcmp.gt.f32.partialorder %v1584_v18, 20.0  ;;  %v1670_v16 = vpop.eup %1095  ;;  %vm1674_vm4 = vcmp.lt.f32.partialorder %v458_v3, 0.0004427343  ;;  %1107 = vlog2.f32 %v461_v8  ;;  %v467_v22 = vand.u32 2147483647, %v1090_v63 }
  0x5a   : > { %304 = vst [vmem:[%s1551_s8 + $0xa8] sm:$0xff] %v272_v47  ;;  %v470_v23 = vadd.f32 1.0, %v1092_v4  ;;  %v1678_v25 = vpop.eup %1097  ;;  %v448_v26 = vmul.f32 %v1086_v53, %v447_v7  ;;  %v465_v27 = vadd.f32 1.0, %v464_v14  ;;  %v473_v28 = vmul.f32 -0.5, %v1092_v4 }
  0x5b   : > { %305 = vst [vmem:[%s1551_s8 + $0xb0] sm:$0xff] %v273_v50  ;;  %v476_v29 = vand.u32 2147483647, %v1092_v4  ;;  %vm734_vm5 = vcmp.gt.f32.partialorder %v1587_v19, 20.0  ;;  %v1683_v30 = vpop.eup %1099  ;;  %v1687_v32 = vmul.f32 %v1088_v59, %v456_v13  ;;  %v479_v33 = vadd.f32 1.0, %v1654_v10 }
  0x5c   : > { %306 = vst [vmem:[%s1551_s8 + $0xb8] sm:$0xff] %v274_v51  ;;  %1109 = vlog2.f32 %v470_v23  ;;  %v482_v35 = vmul.f32 -0.5, %v1654_v10  ;;  %v1692_v39 = vpop.eup %1101  ;;  %v466_v40 = vmul.f32 %v1090_v63, %v465_v27  ;;  %vm1695_vm6 = vcmp.lt.f32.partialorder %v467_v22, 0.0004427343 }
  0x5d   : > { %307 = vst [vmem:[%s1551_s8 + $0xc0] sm:$0xff] %v275_v54  ;;  %v474_v42 = vadd.f32 1.0, %v473_v28  ;;  %v485_v43 = vand.u32 2147483647, %v1654_v10  ;;  %vm735_vm7 = vcmp.gt.f32.partialorder %v1595_v24, 20.0  ;;  %v1104_v44 = vpop.eup %1103  ;;  %1111 = vlog2.f32 %v479_v33 }
  0x5e   : > { %308 = vst [vmem:[%s1551_s8 + $0xc8] sm:$0xff] %v276_v55  ;;  %v483_v47 = vadd.f32 1.0, %v482_v35  ;;  %v488_v48 = vadd.f32 1.0, %v1670_v16  ;;  %v491_v49 = vmul.f32 -0.5, %v1670_v16  ;;  %v1106_v50 = vpop.eup %1105  ;;  %v445_v51 = vmul.f32 0.6931472, %v1104_v44 }
  0x5f   : > { %309 = vst [vmem:[%s1551_s8 + $0xd0] sm:$0xff] %v277_v0  ;;  %v475_v52 = vmul.f32 %v1092_v4, %v474_v42  ;;  %vm1705_vm8 = vcmp.lt.f32.partialorder %v476_v29, 0.0004427343  ;;  %vm736_vm9 = vcmp.gt.f32.partialorder %v1605_v34, 20.0  ;;  %v497_v54 = vadd.f32 1.0, %v1678_v25  ;;  %v1108_v55 = vpop.eup %1107 }
  0x60   : > { %310 = vst [vmem:[%s1551_s8 + $0xd8] sm:$0xff] %v278_v5  ;;  %v454_v59 = vmul.f32 0.6931472, %v1106_v50  ;;  %vm1716_vm10 = vcmp.lt.f32.partialorder %v485_v43, 0.0004427343  ;;  %1113 = vlog2.f32 %v488_v48  ;;  %v492_v61 = vadd.f32 1.0, %v491_v49 }
  0x61   : > { %311 = vst [vmem:[%s1551_s8 + $0xe0] sm:$0xff] %v279_v6  ;;  %vm737_vm11 = vcmp.gt.f32.partialorder %v1610_v36, 20.0  ;;  %v451_v62 = vsel %vm1658_vm2, %v448_v26, %v445_v51  ;;  %v463_v63 = vmul.f32 0.6931472, %v1108_v55  ;;  %v484_v0 = vmul.f32 %v1654_v10, %v483_v47 }
  0x62   : > { %312 = vst [vmem:[%s1551_s8 + $0xe8] sm:$0xff] %v280_v11  ;;  %1115 = vlog2.f32 %v497_v54  ;;  %v1110_v1 = vpop.eup %1109  ;;  %v763_v2 = vsel %vm731_vm0, %v1576_v15, %v451_v62  ;;  %v460_v3 = vsel %vm1674_vm4, %v1687_v32, %v454_v59  ;;  %v494_v4 = vand.u32 2147483647, %v1670_v16 }
  0x63   : > { %313 = vst [vmem:[%s1551_s8 + $0xf0] sm:$0xff] %v281_v20  ;;  %v500_v5 = vmul.f32 -0.5, %v1678_v25 }
  0x64   : > { %314 = vst [vmem:[%s1551_s8 + $0xf8] sm:$0xff] %v282_v31 }
  0x65   : > { %1300 = shalt.err (!%p1297_p7)
}
  0x66   : > { %s1380_s29 = smov 128   ;;  %s1381_s0 = smov 8   ;;  %v764_v15 = vsel %vm732_vm1, %v1581_v17, %v460_v3  ;;  %v469_v6 = vsel %vm1695_vm6, %v466_v40, %v463_v63  ;;  %v472_v7 = vmul.f32 0.6931472, %v1110_v1  ;;  %v493_v8 = vmul.f32 %v1670_v16, %v492_v61  ;;  %v1112_v10 = vpop.eup %1111  ;;  %v1779_v27 = vld [vmem:[%s1541_s21 + $0x60] sm:$0xff]  ;;  %v1815_v51 = vld [vmem:[%s1541_s21 + $0x68] sm:$0xff] }
  0x67   : > { %1028 = dma.vmem_to_hbm [thread:$0]  (%p1452_p11), %s1711_s19, 4096, %s1713_s22, %s828_s5, %s1380_s29, %s1380_s29, %s1381_s0   ;;  %v765_v11 = vsel %vm733_vm3, %v1584_v18, %v469_v6  ;;  %v501_v12 = vadd.f32 1.0, %v500_v5  ;;  %v503_v13 = vand.u32 2147483647, %v1678_v25  ;;  %v506_v14 = vadd.f32 1.0, %v1683_v30  ;;  %v1114_v22 = vpop.eup %1113 }
  0x68   : > { %s1750_s8 = scalar_lea.vmem [#allocation8], %s1529_s28  ;;  %v478_v17 = vsel %vm1705_vm8, %v475_v52, %v472_v7  ;;  %v481_v20 = vmul.f32 0.6931472, %v1112_v10  ;;  %v509_v16 = vmul.f32 -0.5, %v1683_v30  ;;  %v512_v21 = vand.u32 2147483647, %v1683_v30  ;;  %v1116_v28 = vpop.eup %1115  ;;  %s861_s30 = scalar_lea.hbm %s2205_s3, %s1022_s23 }
  0x69   : > { %795 = vst [vmem:[%s1750_s8] sm:$0xff] %v763_v2  ;;  %v766_v18 = vsel %vm734_vm5, %v1587_v19, %v478_v17  ;;  %vm1773_vm12 = vcmp.lt.f32.partialorder %v494_v4, 0.0004427343  ;;  %v502_v26 = vmul.f32 %v1678_v25, %v501_v12  ;;  %1117 = vlog2.f32 %v506_v14  ;;  %v1818_v52 = vld [vmem:[%s1541_s21 + $0x70] sm:$0xff]  ;;  %v1826_v55 = vld [vmem:[%s1541_s21 + $0x78] sm:$0xff]  ;;  %s862_s4 = sshll.u32 %s1750_s8, 4  ;;  %s864_s6 = sshll.u32 %s861_s30, 4  ;;  %s863_s4 = int_to_ptr.vmem [resolvable:$true] %s862_s4  ;;  %s865_s6 = int_to_ptr.hbm [resolvable:$true] %s864_s6 }
  0x6a   : > { %796 = vst [vmem:[%s1750_s8 + $0x8] sm:$0xff] %v764_v15  ;;  %v487_v29 = vsel %vm1716_vm10, %v484_v0, %v481_v20  ;;  %v490_v31 = vmul.f32 0.6931472, %v1114_v22  ;;  %vm1784_vm13 = vcmp.lt.f32.partialorder %v503_v13, 0.0004427343  ;;  %v510_v19 = vadd.f32 1.0, %v509_v16 }
  0x6b   : > { %797 = vst [vmem:[%s1750_s8 + $0x10] sm:$0xff] %v765_v11  ;;  %v767_v33 = vsel %vm735_vm7, %v1595_v24, %v487_v29  ;;  %v499_v25 = vmul.f32 0.6931472, %v1116_v28  ;;  %v515_v35 = vadd.f32 1.0, %v1692_v39  ;;  %v518_v40 = vmul.f32 -0.5, %v1692_v39  ;;  %v1843_v15 = vld [vmem:[%s1541_s21 + $0x80] sm:$0xff] }
  0x6c   : > { %798 = vst [vmem:[%s1750_s8 + $0x18] sm:$0xff] %v766_v18  ;;  %v496_v41 = vsel %vm1773_vm12, %v493_v8, %v490_v31  ;;  %vm1796_vm14 = vcmp.lt.f32.partialorder %v512_v21, 0.0004427343  ;;  %v397_v43 = vmul.f32 1.442695, %v356_v56  ;;  %v359_v24 = vmin.f32 %v1779_v27, 20.0 }
  0x6d   : > { %799 = vst [vmem:[%s1750_s8 + $0x20] sm:$0xff] %v767_v33  ;;  %v768_v44 = vsel %vm736_vm9, %v1605_v34, %v496_v41  ;;  %v505_v47 = vsel %vm1784_vm13, %v502_v26, %v499_v25  ;;  %1119 = vlog2.f32 %v515_v35  ;;  %v521_v48 = vand.u32 2147483647, %v1692_v39  ;;  %s833_s16 = scalar_lea.sflag [#allocation9], %s1526_s26  ;;  %s1315_s19 = sshra.s32 %s865_s6, 4  ;;  %s1316_s19 = int_to_ptr.hbm [resolvable:$true] %s1315_s19 }
  0x6e   : > { %800 = vst [vmem:[%s1750_s8 + $0x28] sm:$0xff] %v768_v44  ;;  %v769_v49 = vsel %vm737_vm11, %v1610_v36, %v505_v47  ;;  %v511_v56 = vmul.f32 %v1683_v30, %v510_v19  ;;  %v519_v50 = vadd.f32 1.0, %v518_v40  ;;  %1121 = vpow2.f32 %v397_v43  ;;  %s1317_s22 = scalar_lea.hbm %s1316_s19, 256  ;;  %s1321_s7 = scalar_lea.hbm %s2205_s3, 512 }
  0x6f   : > { %v1118_v34 = vpop.eup %1117  ;;  %801 = vst [vmem:[%s1750_s8 + $0x30] sm:$0xff] %v769_v49  ;;  %v399_v53 = vmul.f32 1.442695, %v357_v57  ;;  %v401_v54 = vmul.f32 1.442695, %v358_v9  ;;  %vm738_vm15 = vcmp.gt.f32.partialorder %v1613_v37, 20.0  ;;  %p1318_p0 = scmp.ne.s32.totalorder %s1316_s19, %s1317_s22  ;;  %p1322_p1 = scmp.lt.s32.totalorder %s1316_s19, %s2205_s3 }
  0x70   : > { %v508_v59 = vmul.f32 0.6931472, %v1118_v34  ;;  %vm739_vm0 = vcmp.gt.f32.partialorder %v1616_v38, 20.0  ;;  %v403_v36 = vmul.f32 1.442695, %v359_v24  ;;  %v360_v57 = vmin.f32 %v1815_v51, 20.0  ;;  %p1323_p6 = scmp.lt.s32.totalorder %s1321_s7, %s1317_s22 }
  0x71   : > { %vm1830_vm1 = vcmp.lt.f32.partialorder %v521_v48, 0.0004427343  ;;  %1123 = vpow2.f32 %v399_v53  ;;  %v361_v60 = vmin.f32 %v1818_v52, 20.0  ;;  %v520_v61 = vmul.f32 %v1692_v39, %v519_v50  ;;  %p1319_p8 = pnand %p1318_p0, %p1452_p11 }
  0x72   : > { %v514_v9 = vsel %vm1796_vm14, %v511_v56, %v508_v59  ;;  %1125 = vpow2.f32 %v401_v54  ;;  %v362_v62 = vmin.f32 %v1826_v55, 20.0  ;;  %v405_v1 = vmul.f32 1.442695, %v360_v57  ;;  %p1324_p13 = por %p1323_p6, %p1322_p1 }
  0x73   : > { %v1120_v63 = vpop.eup %1119  ;;  %v770_v0 = vsel %vm738_vm15, %v1613_v37, %v514_v9  ;;  %1127 = vpow2.f32 %v403_v36  ;;  %v407_v2 = vmul.f32 1.442695, %v361_v60  ;;  %vm740_vm2 = vcmp.gt.f32.partialorder %v1626_v45, 20.0  ;;  %v1849_v37 = vld [vmem:[%s1541_s21 + $0x88] sm:$0xff]  ;;  %p1320_p10 = pneg %p1319_p8 }
  0x74   : > { %v1122_v3 = vpop.eup %1121  ;;  %802 = vst [vmem:[%s1750_s8 + $0x38] sm:$0xff] %v770_v0  ;;  %v517_v4 = vmul.f32 0.6931472, %v1120_v63  ;;  %v409_v5 = vmul.f32 1.442695, %v362_v62  ;;  %1129 = vpow2.f32 %v405_v1  ;;  %v363_v13 = vmin.f32 %v1843_v15, 20.0 }
  0x75   : > { %v524_v6 = vadd.f32 1.0, %v1122_v3  ;;  %v527_v7 = vmul.f32 -0.5, %v1122_v3  ;;  %v530_v8 = vand.u32 2147483647, %v1122_v3  ;;  %1131 = vpow2.f32 %v407_v2  ;;  %v2018_v63 = vld [vmem:[%s1541_s21 + $0xc8] sm:$0xff]  ;;  %p1325_p2 = pnand %p1324_p13, %p1320_p10 }
  0x76   : > { %v523_v39 = vsel %vm1830_vm1, %v520_v61, %v517_v4  ;;  %vm741_vm3 = vcmp.gt.f32.partialorder %v1629_v46, 20.0  ;;  %v364_v26 = vmin.f32 %v1849_v37, 20.0  ;;  %vm742_vm5 = vcmp.gt.f32.partialorder %v1642_v58, 20.0 }
  0x77   : > { %v1124_v10 = vpop.eup %1123  ;;  %v771_v11 = vsel %vm739_vm0, %v1616_v38, %v523_v39  ;;  %1133 = vlog2.f32 %v524_v6  ;;  %v528_v12 = vadd.f32 1.0, %v527_v7  ;;  %vm1858_vm4 = vcmp.lt.f32.partialorder %v530_v8, 0.0004427343 }
  0x78   : > { %v1126_v14 = vpop.eup %1125  ;;  %803 = vst [vmem:[%s1750_s8 + $0x40] sm:$0xff] %v771_v11  ;;  %v533_v17 = vadd.f32 1.0, %v1124_v10  ;;  %v536_v20 = vmul.f32 -0.5, %v1124_v10  ;;  %v539_v16 = vand.u32 2147483647, %v1124_v10  ;;  %1135 = vpow2.f32 %v409_v5 }
  0x79   : > { %v1128_v21 = vpop.eup %1127  ;;  %v542_v22 = vadd.f32 1.0, %v1126_v14  ;;  %v545_v18 = vmul.f32 -0.5, %v1126_v14  ;;  %v548_v23 = vand.u32 2147483647, %v1126_v14  ;;  %v529_v32 = vmul.f32 %v1122_v3, %v528_v12 }
  0x7a   : > { %1137 = vlog2.f32 %v533_v17  ;;  %v537_v28 = vadd.f32 1.0, %v536_v20  ;;  %v551_v29 = vadd.f32 1.0, %v1128_v21  ;;  %v1130_v31 = vpop.eup %1129  ;;  %v554_v33 = vmul.f32 -0.5, %v1128_v21 }
  0x7b   : > { %1139 = vlog2.f32 %v542_v22  ;;  %v546_v19 = vadd.f32 1.0, %v545_v18  ;;  %vm743_vm6 = vcmp.gt.f32.partialorder %v1779_v27, 20.0  ;;  %v1132_v25 = vpop.eup %1131  ;;  %vm1864_vm7 = vcmp.lt.f32.partialorder %v539_v16, 0.0004427343 }
  0x7c   : > { %1141 = vlog2.f32 %v551_v29  ;;  %v557_v40 = vand.u32 2147483647, %v1128_v21  ;;  %v560_v41 = vadd.f32 1.0, %v1130_v31  ;;  %vm1868_vm8 = vcmp.lt.f32.partialorder %v548_v23, 0.0004427343  ;;  %v1923_v29 = vld [vmem:[%s1541_s21 + $0xa0] sm:$0xff] }
  0x7d   : > { %v1134_v42 = vpop.eup %1133  ;;  %v555_v24 = vadd.f32 1.0, %v554_v33  ;;  %v563_v44 = vmul.f32 -0.5, %v1130_v31  ;;  %v566_v47 = vand.u32 2147483647, %v1130_v31  ;;  %vm744_vm9 = vcmp.gt.f32.partialorder %v1815_v51, 20.0 }
  0x7e   : > { %v1136_v48 = vpop.eup %1135  ;;  %v526_v49 = vmul.f32 0.6931472, %v1134_v42  ;;  %v538_v56 = vmul.f32 %v1124_v10, %v537_v28  ;;  %1143 = vlog2.f32 %v560_v41  ;;  %v569_v50 = vadd.f32 1.0, %v1132_v25 }
  0x7f   : > { %v547_v34 = vmul.f32 %v1126_v14, %v546_v19  ;;  %vm1873_vm10 = vcmp.lt.f32.partialorder %v557_v40, 0.0004427343  ;;  %v564_v54 = vadd.f32 1.0, %v563_v44  ;;  %v572_v59 = vmul.f32 -0.5, %v1132_v25 }
  0x80   : > { %v1138_v36 = vpop.eup %1137  ;;  %v532_v30 = vsel %vm1858_vm4, %v529_v32, %v526_v49  ;;  %v556_v57 = vmul.f32 %v1128_v21, %v555_v24  ;;  %1145 = vlog2.f32 %v569_v50  ;;  %v578_v60 = vadd.f32 1.0, %v1136_v48  ;;  %v1906_v21 = vld [vmem:[%s1541_s21 + $0x98] sm:$0xff] }
  0x81   : > { %v1140_v9 = vpop.eup %1139  ;;  %v772_v61 = vsel %vm740_vm2, %v1626_v45, %v532_v30  ;;  %v535_v62 = vmul.f32 0.6931472, %v1138_v36  ;;  %vm1882_vm11 = vcmp.lt.f32.partialorder %v566_v47, 0.0004427343  ;;  %v573_v0 = vadd.f32 1.0, %v572_v59  ;;  %v1955_v50 = vld [vmem:[%s1541_s21 + $0xb8] sm:$0xff] }
  0x82   : > { %v1142_v1 = vpop.eup %1141  ;;  %804 = vst [vmem:[%s1750_s8 + $0x48] sm:$0xff] %v772_v61  ;;  %v544_v2 = vmul.f32 0.6931472, %v1140_v9  ;;  %v575_v3 = vand.u32 2147483647, %v1132_v25  ;;  %1147 = vlog2.f32 %v578_v60  ;;  %v581_v4 = vmul.f32 -0.5, %v1136_v48 }
  0x83   : > { %v541_v5 = vsel %vm1864_vm7, %v538_v56, %v535_v62  ;;  %v553_v6 = vmul.f32 0.6931472, %v1142_v1  ;;  %v565_v45 = vmul.f32 %v1130_v31, %v564_v54  ;;  %v584_v7 = vand.u32 2147483647, %v1136_v48 }
  0x84   : > { %v1144_v39 = vpop.eup %1143  ;;  %v773_v8 = vsel %vm741_vm3, %v1629_v46, %v541_v5  ;;  %v550_v10 = vsel %vm1868_vm8, %v547_v34, %v544_v2  ;;  %v582_v11 = vadd.f32 1.0, %v581_v4  ;;  %v411_v12 = vmul.f32 1.442695, %v363_v13  ;;  %v1903_v46 = vld [vmem:[%s1541_s21 + $0x90] sm:$0xff] }
  0x85   : > { %805 = vst [vmem:[%s1750_s8 + $0x50] sm:$0xff] %v773_v8  ;;  %v774_v14 = vsel %vm742_vm5, %v1642_v58, %v550_v10  ;;  %v559_v17 = vsel %vm1873_vm10, %v556_v57, %v553_v6  ;;  %v562_v20 = vmul.f32 0.6931472, %v1144_v39  ;;  %v574_v16 = vmul.f32 %v1132_v25, %v573_v0  ;;  %v1935_v25 = vld [vmem:[%s1541_s21 + $0xa8] sm:$0xff]  ;;  %v1966_v0 = vld [vmem:[%s1541_s21 + $0xc0] sm:$0xff] }
  0x86   : > { %v1146_v22 = vpop.eup %1145  ;;  %806 = vst [vmem:[%s1750_s8 + $0x58] sm:$0xff] %v774_v14  ;;  %v775_v13 = vsel %vm743_vm6, %v1779_v27, %v559_v17  ;;  %vm1912_vm12 = vcmp.lt.f32.partialorder %v575_v3, 0.0004427343  ;;  %vm745_vm13 = vcmp.gt.f32.partialorder %v1818_v52, 20.0  ;;  %1149 = vpow2.f32 %v411_v12 }
  0x87   : > { %807 = vst [vmem:[%s1750_s8 + $0x60] sm:$0xff] %v775_v13  ;;  %v568_v18 = vsel %vm1882_vm11, %v565_v45, %v562_v20  ;;  %v571_v23 = vmul.f32 0.6931472, %v1146_v22  ;;  %v583_v38 = vmul.f32 %v1136_v48, %v582_v11  ;;  %v413_v28 = vmul.f32 1.442695, %v364_v26 }
  0x88   : > { %v1148_v27 = vpop.eup %1147  ;;  %v776_v31 = vsel %vm744_vm9, %v1815_v51, %v568_v18  ;;  %vm1928_vm14 = vcmp.lt.f32.partialorder %v584_v7, 0.0004427343  ;;  %v365_v19 = vmin.f32 %v1903_v46, 20.0  ;;  %v366_v33 = vmin.f32 %v1906_v21, 20.0  ;;  %v1942_v51 = vld [vmem:[%s1541_s21 + $0xb0] sm:$0xff] }
  0x89   : > { %808 = vst [vmem:[%s1750_s8 + $0x68] sm:$0xff] %v776_v31  ;;  %v577_v26 = vsel %vm1912_vm12, %v574_v16, %v571_v23  ;;  %v580_v35 = vmul.f32 0.6931472, %v1148_v27  ;;  %vm746_vm15 = vcmp.gt.f32.partialorder %v1826_v55, 20.0  ;;  %1151 = vpow2.f32 %v413_v28 }
  0x8a   : > { %v777_v40 = vsel %vm745_vm13, %v1818_v52, %v577_v26  ;;  %v415_v41 = vmul.f32 1.442695, %v365_v19  ;;  %v417_v42 = vmul.f32 1.442695, %v366_v33  ;;  %v367_v43 = vmin.f32 %v1923_v29, 20.0 }
  0x8b   : > { %809 = vst [vmem:[%s1750_s8 + $0x70] sm:$0xff] %v777_v40  ;;  %v586_v24 = vsel %vm1928_vm14, %v583_v38, %v580_v35  ;;  %v368_v44 = vmin.f32 %v1935_v25, 20.0  ;;  %v369_v56 = vmin.f32 %v1942_v51, 20.0  ;;  %vm747_vm1 = vcmp.gt.f32.partialorder %v1843_v15, 20.0 }
  0x8c   : > { %v1150_v47 = vpop.eup %1149  ;;  %v778_v48 = vsel %vm746_vm15, %v1826_v55, %v586_v24  ;;  %1153 = vpow2.f32 %v415_v41  ;;  %v419_v49 = vmul.f32 1.442695, %v367_v43  ;;  %v370_v55 = vmin.f32 %v1955_v50, 20.0 }
  0x8d   : > { %810 = vst [vmem:[%s1750_s8 + $0x78] sm:$0xff] %v778_v48  ;;  %v587_v52 = vadd.f32 1.0, %v1150_v47  ;;  %v590_v34 = vmul.f32 -0.5, %v1150_v47  ;;  %1155 = vpow2.f32 %v417_v42  ;;  %v593_v53 = vand.u32 2147483647, %v1150_v47 }
  0x8e   : > { %1157 = vpow2.f32 %v419_v49  ;;  %v421_v54 = vmul.f32 1.442695, %v368_v44  ;;  %v423_v59 = vmul.f32 1.442695, %v369_v56  ;;  %v425_v61 = vmul.f32 1.442695, %v370_v55 }
  0x8f   : > { %v1152_v36 = vpop.eup %1151  ;;  %1159 = vlog2.f32 %v587_v52  ;;  %v591_v30 = vadd.f32 1.0, %v590_v34  ;;  %vm1959_vm0 = vcmp.lt.f32.partialorder %v593_v53, 0.0004427343  ;;  %vm748_vm2 = vcmp.gt.f32.partialorder %v1849_v37, 20.0 }
  0x90   : > { %v596_v57 = vadd.f32 1.0, %v1152_v36  ;;  %v599_v60 = vmul.f32 -0.5, %v1152_v36  ;;  %1161 = vpow2.f32 %v421_v54  ;;  %v602_v9 = vand.u32 2147483647, %v1152_v36 }
  0x91   : > { %1163 = vpow2.f32 %v423_v59  ;;  %v592_v2 = vmul.f32 %v1150_v47, %v591_v30  ;;  %vm749_vm3 = vcmp.gt.f32.partialorder %v1903_v46, 20.0  ;;  %vm750_vm5 = vcmp.gt.f32.partialorder %v1906_v21, 20.0 }
  0x92   : > { %v1154_v62 = vpop.eup %1153  ;;  %1165 = vlog2.f32 %v596_v57  ;;  %v600_v3 = vadd.f32 1.0, %v599_v60  ;;  %vm1969_vm4 = vcmp.lt.f32.partialorder %v602_v9, 0.0004427343  ;;  %v371_v12 = vmin.f32 %v1966_v0, 20.0 }
  0x93   : > { %v1156_v1 = vpop.eup %1155  ;;  %v605_v4 = vadd.f32 1.0, %v1154_v62  ;;  %v608_v5 = vmul.f32 -0.5, %v1154_v62  ;;  %v611_v45 = vand.u32 2147483647, %v1154_v62  ;;  %1167 = vpow2.f32 %v425_v61 }
  0x94   : > { %v1158_v6 = vpop.eup %1157  ;;  %v614_v7 = vadd.f32 1.0, %v1156_v1  ;;  %v617_v39 = vmul.f32 -0.5, %v1156_v1  ;;  %v620_v16 = vand.u32 2147483647, %v1156_v1  ;;  %vm751_vm6 = vcmp.gt.f32.partialorder %v1923_v29, 20.0 }
  0x95   : > { %v1160_v8 = vpop.eup %1159  ;;  %1169 = vlog2.f32 %v605_v4  ;;  %v623_v11 = vadd.f32 1.0, %v1158_v6  ;;  %v609_v20 = vadd.f32 1.0, %v608_v5  ;;  %v601_v13 = vmul.f32 %v1152_v36, %v600_v3  ;;  %v2031_v4 = vld [vmem:[%s1541_s21 + $0xd0] sm:$0xff]  ;;  %v2034_v5 = vld [vmem:[%s1541_s21 + $0xd8] sm:$0xff] }
  0x96   : > { %v1162_v14 = vpop.eup %1161  ;;  %v589_v17 = vmul.f32 0.6931472, %v1160_v8  ;;  %1171 = vlog2.f32 %v614_v7  ;;  %v618_v58 = vadd.f32 1.0, %v617_v39  ;;  %v626_v18 = vmul.f32 -0.5, %v1158_v6 }
  0x97   : > { %v1976_v22 = vpop.eup %1163  ;;  %1173 = vlog2.f32 %v623_v11  ;;  %vm1980_vm7 = vcmp.lt.f32.partialorder %v611_v45, 0.0004427343  ;;  %v632_v27 = vadd.f32 1.0, %v1162_v14  ;;  %v635_v31 = vmul.f32 -0.5, %v1162_v14 }
  0x98   : > { %v1166_v23 = vpop.eup %1165  ;;  %v595_v38 = vsel %vm1959_vm0, %v592_v2, %v589_v17  ;;  %v627_v33 = vadd.f32 1.0, %v626_v18  ;;  %v629_v26 = vand.u32 2147483647, %v1158_v6  ;;  %vm752_vm8 = vcmp.gt.f32.partialorder %v1935_v25, 20.0  ;;  %v2065_v18 = vld [vmem:[%s1541_s21 + $0xf0] sm:$0xff] }
  0x99   : > { %v779_v32 = vsel %vm747_vm1, %v1843_v15, %v595_v38  ;;  %v598_v19 = vmul.f32 0.6931472, %v1166_v23  ;;  %v1988_v35 = vpop.eup %1167  ;;  %v610_v40 = vmul.f32 %v1154_v62, %v609_v20  ;;  %vm1991_vm9 = vcmp.lt.f32.partialorder %v620_v16, 0.0004427343  ;;  %v2056_v16 = vld [vmem:[%s1541_s21 + $0xe0] sm:$0xff] }
  0x9a   : > { %811 = vst [vmem:[%s1750_s8 + $0x80] sm:$0xff] %v779_v32  ;;  %1175 = vlog2.f32 %v632_v27  ;;  %v641_v42 = vadd.f32 1.0, %v1976_v22  ;;  %v619_v24 = vmul.f32 %v1156_v1, %v618_v58  ;;  %v636_v44 = vadd.f32 1.0, %v635_v31  ;;  %v2062_v58 = vld [vmem:[%s1541_s21 + $0xe8] sm:$0xff] }
  0x9b   : > { %v1170_v43 = vpop.eup %1169  ;;  %v604_v15 = vsel %vm1969_vm4, %v601_v13, %v598_v19  ;;  %v644_v47 = vmul.f32 -0.5, %v1976_v22  ;;  %v628_v52 = vmul.f32 %v1158_v6, %v627_v33  ;;  %v638_v34 = vand.u32 2147483647, %v1162_v14  ;;  %v2078_v19 = vld [vmem:[%s1541_s21 + $0xf8] sm:$0xff] }
  0x9c   : > { %v1172_v48 = vpop.eup %1171  ;;  %v780_v49 = vsel %vm748_vm2, %v1849_v37, %v604_v15  ;;  %v607_v56 = vmul.f32 0.6931472, %v1170_v43  ;;  %vm2003_vm10 = vcmp.lt.f32.partialorder %v629_v26, 0.0004427343  ;;  %1177 = vlog2.f32 %v641_v42 }
  0x9d   : > { %v1174_v53 = vpop.eup %1173  ;;  %812 = vst [vmem:[%s1750_s8 + $0x88] sm:$0xff] %v780_v49  ;;  %v616_v54 = vmul.f32 0.6931472, %v1172_v48  ;;  %v645_v36 = vadd.f32 1.0, %v644_v47  ;;  %v650_v55 = vadd.f32 1.0, %v1988_v35  ;;  %v653_v57 = vmul.f32 -0.5, %v1988_v35 }
  0x9e   : > { %v613_v30 = vsel %vm1980_vm7, %v610_v40, %v607_v56  ;;  %v625_v37 = vmul.f32 0.6931472, %v1174_v53  ;;  %v637_v61 = vmul.f32 %v1162_v14, %v636_v44  ;;  %v647_v62 = vand.u32 2147483647, %v1976_v22 }
  0x9f   : > { %v781_v60 = vsel %vm749_vm3, %v1903_v46, %v613_v30  ;;  %v622_v9 = vsel %vm1991_vm9, %v619_v24, %v616_v54  ;;  %vm2026_vm11 = vcmp.lt.f32.partialorder %v638_v34, 0.0004427343  ;;  %1179 = vlog2.f32 %v650_v55 }
  0xa0   : > { %v1176_v1 = vpop.eup %1175  ;;  %813 = vst [vmem:[%s1750_s8 + $0x90] sm:$0xff] %v781_v60  ;;  %v782_v2 = vsel %vm750_vm5, %v1906_v21, %v622_v9  ;;  %v631_v3 = vsel %vm2003_vm10, %v628_v52, %v625_v37  ;;  %vm753_vm12 = vcmp.gt.f32.partialorder %v1942_v51, 20.0  ;;  %v654_v21 = vadd.f32 1.0, %v653_v57 }
  0xa1   : > { %814 = vst [vmem:[%s1750_s8 + $0x98] sm:$0xff] %v782_v2  ;;  %v783_v6 = vsel %vm751_vm6, %v1923_v29, %v631_v3  ;;  %v634_v45 = vmul.f32 0.6931472, %v1176_v1  ;;  %v646_v7 = vmul.f32 %v1976_v22, %v645_v36  ;;  %v656_v39 = vand.u32 2147483647, %v1988_v35 }
  0xa2   : > { %815 = vst [vmem:[%s1750_s8 + $0xa0] sm:$0xff] %v783_v6  ;;  %v427_v8 = vmul.f32 1.442695, %v371_v12  ;;  %v372_v10 = vmin.f32 %v2018_v63, 20.0  ;;  %v1178_v11 = vpop.eup %1177  ;;  %vm2049_vm13 = vcmp.lt.f32.partialorder %v647_v62, 0.0004427343  ;;  %v655_v23 = vmul.f32 %v1988_v35, %v654_v21 }
  0xa3   : > { %v640_v29 = vsel %vm2026_vm11, %v637_v61, %v634_v45  ;;  %v373_v17 = vmin.f32 %v2031_v4, 20.0  ;;  %v374_v20 = vmin.f32 %v2034_v5, 20.0  ;;  %v643_v22 = vmul.f32 0.6931472, %v1178_v11 }
  0xa4   : > { %v784_v12 = vsel %vm752_vm8, %v1935_v25, %v640_v29  ;;  %1181 = vpow2.f32 %v427_v8  ;;  %v429_v13 = vmul.f32 1.442695, %v372_v10  ;;  %vm754_vm14 = vcmp.gt.f32.partialorder %v1955_v50, 20.0 }
  0xa5   : > { %816 = vst [vmem:[%s1750_s8 + $0xa8] sm:$0xff] %v784_v12  ;;  %v431_v38 = vmul.f32 1.442695, %v373_v17  ;;  %v433_v28 = vmul.f32 1.442695, %v374_v20  ;;  %v1180_v27 = vpop.eup %1179  ;;  %v649_v25 = vsel %vm2049_vm13, %v646_v7, %v643_v22  ;;  %v375_v32 = vmin.f32 %v2056_v16, 20.0 }
  0xa6   : > { %vm2072_vm15 = vcmp.lt.f32.partialorder %v656_v39, 0.0004427343  ;;  %1183 = vpow2.f32 %v429_v13  ;;  %v785_v33 = vsel %vm753_vm12, %v1942_v51, %v649_v25  ;;  %v652_v26 = vmul.f32 0.6931472, %v1180_v27 }
  0xa7   : > { %1185 = vpow2.f32 %v431_v38  ;;  %v376_v35 = vmin.f32 %v2062_v58, 20.0  ;;  %817 = vst [vmem:[%s1750_s8 + $0xb0] sm:$0xff] %v785_v33  ;;  %v435_v40 = vmul.f32 1.442695, %v375_v32  ;;  %v377_v41 = vmin.f32 %v2065_v18, 20.0 }
  0xa8   : > { %1187 = vpow2.f32 %v433_v28  ;;  %v658_v42 = vsel %vm2072_vm15, %v655_v23, %v652_v26  ;;  %v378_v15 = vmin.f32 %v2078_v19, 20.0  ;;  %vm755_vm0 = vcmp.gt.f32.partialorder %v1966_v0, 20.0 }
  0xa9   : > { %v437_v43 = vmul.f32 1.442695, %v376_v35  ;;  %v786_v51 = vsel %vm754_vm14, %v1955_v50, %v658_v42  ;;  %1189 = vpow2.f32 %v435_v40  ;;  %v439_v44 = vmul.f32 1.442695, %v377_v41 }
  0xaa   : > { %v1182_v24 = vpop.eup %1181  ;;  %818 = vst [vmem:[%s1750_s8 + $0xb8] sm:$0xff] %v786_v51  ;;  %v2094_v54 = vmul.f32 1.442695, %v378_v15  ;;  %vm756_vm1 = vcmp.gt.f32.partialorder %v2018_v63, 20.0  ;;  %vm757_vm3 = vcmp.gt.f32.partialorder %v2031_v4, 20.0  ;;  %vm758_vm4 = vcmp.gt.f32.partialorder %v2034_v5, 20.0 }
  0xab   : > { %v659_v47 = vadd.f32 1.0, %v1182_v24  ;;  %v662_v48 = vmul.f32 -0.5, %v1182_v24  ;;  %v665_v49 = vand.u32 2147483647, %v1182_v24  ;;  %1191 = vpow2.f32 %v437_v43 }
  0xac   : > { %v1184_v56 = vpop.eup %1183  ;;  %1193 = vpow2.f32 %v439_v44  ;;  %vm759_vm10 = vcmp.gt.f32.partialorder %v2056_v16, 20.0  ;;  %vm760_vm11 = vcmp.gt.f32.partialorder %v2062_v58, 20.0  ;;  %vm761_vm13 = vcmp.gt.f32.partialorder %v2065_v18, 20.0 }
  0xad   : > { %v1186_v52 = vpop.eup %1185  ;;  %1195 = vlog2.f32 %v659_v47  ;;  %v663_v34 = vadd.f32 1.0, %v662_v48  ;;  %v668_v53 = vadd.f32 1.0, %v1184_v56  ;;  %v671_v36 = vmul.f32 -0.5, %v1184_v56 }
  0xae   : > { %v1188_v59 = vpop.eup %1187  ;;  %v674_v50 = vand.u32 2147483647, %v1184_v56  ;;  %v677_v30 = vadd.f32 1.0, %v1186_v52  ;;  %v680_v37 = vmul.f32 -0.5, %v1186_v52  ;;  %vm2097_vm2 = vcmp.lt.f32.partialorder %v665_v49, 0.0004427343 }
  0xaf   : > { %1197 = vlog2.f32 %v668_v53  ;;  %v683_v57 = vand.u32 2147483647, %v1186_v52  ;;  %v686_v60 = vadd.f32 1.0, %v1188_v59  ;;  %v1190_v9 = vpop.eup %1189  ;;  %v664_v61 = vmul.f32 %v1182_v24, %v663_v34 }
  0xb0   : > { %v672_v62 = vadd.f32 1.0, %v671_v36  ;;  %1199 = vlog2.f32 %v677_v30  ;;  %v681_v1 = vadd.f32 1.0, %v680_v37  ;;  %vm2103_vm5 = vcmp.lt.f32.partialorder %v674_v50, 0.0004427343 }
  0xb1   : > { %v1192_v2 = vpop.eup %1191  ;;  %1201 = vlog2.f32 %v686_v60  ;;  %v689_v46 = vmul.f32 -0.5, %v1188_v59  ;;  %v692_v6 = vand.u32 2147483647, %v1188_v59  ;;  %vm2107_vm6 = vcmp.lt.f32.partialorder %v683_v57, 0.0004427343 }
  0xb2   : > { %v1194_v45 = vpop.eup %1193  ;;  %v673_v21 = vmul.f32 %v1184_v56, %v672_v62  ;;  %v695_v39 = vadd.f32 1.0, %v1190_v9  ;;  %v698_v8 = vmul.f32 -0.5, %v1190_v9  ;;  %v682_v11 = vmul.f32 %v1186_v52, %v681_v1 }
  0xb3   : > { %v1196_v10 = vpop.eup %1195  ;;  %v690_v29 = vadd.f32 1.0, %v689_v46  ;;  %v701_v14 = vand.u32 2147483647, %v1190_v9  ;;  %v704_v17 = vadd.f32 1.0, %v1192_v2  ;;  %v707_v22 = vmul.f32 -0.5, %v1192_v2 }
  0xb4   : > { %v661_v20 = vmul.f32 0.6931472, %v1196_v10  ;;  %1203 = vlog2.f32 %v695_v39  ;;  %v699_v12 = vadd.f32 1.0, %v698_v8  ;;  %vm2111_vm7 = vcmp.lt.f32.partialorder %v692_v6, 0.0004427343 }
  0xb5   : > { %v1198_v13 = vpop.eup %1197  ;;  %v691_v23 = vmul.f32 %v1188_v59, %v690_v29  ;;  %1205 = vlog2.f32 %v704_v17  ;;  %v710_v28 = vand.u32 2147483647, %v1192_v2  ;;  %vm2117_vm8 = vcmp.lt.f32.partialorder %v701_v14, 0.0004427343 }
  0xb6   : > { %v1200_v27 = vpop.eup %1199  ;;  %v667_v25 = vsel %vm2097_vm2, %v664_v61, %v661_v20  ;;  %v670_v31 = vmul.f32 0.6931472, %v1198_v13  ;;  %v708_v33 = vadd.f32 1.0, %v707_v22  ;;  %v700_v41 = vmul.f32 %v1190_v9, %v699_v12 }
  0xb7   : > { %v1202_v26 = vpop.eup %1201  ;;  %v787_v35 = vsel %vm755_vm0, %v1966_v0, %v667_v25  ;;  %v679_v40 = vmul.f32 0.6931472, %v1200_v27  ;;  %v713_v42 = vadd.f32 1.0, %v1194_v45  ;;  %vm2127_vm9 = vcmp.lt.f32.partialorder %v710_v28, 0.0004427343 }
  0xb8   : > { %819 = vst [vmem:[%s1750_s8 + $0xc0] sm:$0xff] %v787_v35  ;;  %v676_v43 = vsel %vm2103_vm5, %v673_v21, %v670_v31  ;;  %v688_v15 = vmul.f32 0.6931472, %v1202_v26  ;;  %v716_v51 = vmul.f32 -0.5, %v1194_v45  ;;  %v709_v47 = vmul.f32 %v1192_v2, %v708_v33 }
  0xb9   : > { %v788_v44 = vsel %vm756_vm1, %v2018_v63, %v676_v43  ;;  %v685_v0 = vsel %vm2107_vm6, %v682_v11, %v679_v40  ;;  %1207 = vlog2.f32 %v713_v42  ;;  %v719_v59 = vand.u32 2147483647, %v1194_v45 }
  0xba   : > { %v1204_v48 = vpop.eup %1203  ;;  %820 = vst [vmem:[%s1750_s8 + $0xc8] sm:$0xff] %v788_v44  ;;  %v789_v49 = vsel %vm757_vm3, %v2031_v4, %v685_v0  ;;  %v694_v56 = vsel %vm2111_vm7, %v691_v23, %v688_v15  ;;  %v717_v52 = vadd.f32 1.0, %v716_v51  ;;  %1209 = vpow2.f32 %v2094_v54 }
  0xbb   : > { %v1206_v63 = vpop.eup %1205  ;;  %821 = vst [vmem:[%s1750_s8 + $0xd0] sm:$0xff] %v789_v49  ;;  %v790_v34 = vsel %vm758_vm4, %v2034_v5, %v694_v56  ;;  %v697_v53 = vmul.f32 0.6931472, %v1204_v48  ;;  %vm720_vm12 = vcmp.lt.f32.partialorder %v719_v59, 0.0004427343  ;;  %vm762_vm15 = vcmp.gt.f32.partialorder %v2078_v19, 20.0 }
  0xbc   : > { %822 = vst [vmem:[%s1750_s8 + $0xd8] sm:$0xff] %v790_v34  ;;  %v706_v4 = vmul.f32 0.6931472, %v1206_v63  ;;  %v718_v30 = vmul.f32 %v1194_v45, %v717_v52 }
  0xbd   : > { %v703_v36 = vsel %vm2117_vm8, %v700_v41, %v697_v53 }
  0xbe   : > { %v791_v54 = vsel %vm759_vm10, %v2056_v16, %v703_v36  ;;  %v712_v50 = vsel %vm2127_vm9, %v709_v47, %v706_v4 }
  0xbf   : > { %v1208_v5 = vpop.eup %1207  ;;  %823 = vst [vmem:[%s1750_s8 + $0xe0] sm:$0xff] %v791_v54  ;;  %v792_v37 = vsel %vm760_vm11, %v2062_v58, %v712_v50 }
  0xc0   : > { %v1210_v55 = vpop.eup %1209  ;;  %824 = vst [vmem:[%s1750_s8 + $0xe8] sm:$0xff] %v792_v37  ;;  %v715_v57 = vmul.f32 0.6931472, %v1208_v5 }
  0xc1   : > { %v722_v60 = vadd.f32 1.0, %v1210_v55  ;;  %v725_v9 = vmul.f32 -0.5, %v1210_v55  ;;  %v728_v1 = vand.u32 2147483647, %v1210_v55 }
  0xc2   : > { %v721_v16 = vsel %vm720_vm12, %v718_v30, %v715_v57 }
  0xc3   : > { %v793_v61 = vsel %vm761_vm13, %v2065_v18, %v721_v16  ;;  %1211 = vlog2.f32 %v722_v60  ;;  %v726_v62 = vadd.f32 1.0, %v725_v9  ;;  %vm729_vm14 = vcmp.lt.f32.partialorder %v728_v1, 0.0004427343 }
  0xc4   : > { %825 = vst [vmem:[%s1750_s8 + $0xf0] sm:$0xff] %v793_v61 }
  0xc5   : > { %v727_v58 = vmul.f32 %v1210_v55, %v726_v62 }
  0xc9   : > { %v1212_v2 = vpop.eup %1211 }
  0xca   : > { %v724_v3 = vmul.f32 0.6931472, %v1212_v2 }
  0xcc   : > { %v730_v18 = vsel %vm729_vm14, %v727_v58, %v724_v3 }
  0xcd   : > { %v794_v46 = vsel %vm762_vm15, %v2078_v19, %v730_v18 }
  0xce   : > { %826 = vst [vmem:[%s1750_s8 + $0xf8] sm:$0xff] %v794_v46 }
  0xcf   : > { %1328 = shalt.err (!%p1325_p2)
}
  0xd0   : > { %1029 = dma.vmem_to_hbm [thread:$0]  (%p1452_p11), %s863_s4, 4096, %s865_s6, %s833_s16, %s1380_s29, %s1380_s29, %s1381_s0  }
  0xd1 PF: > { %s879_s26 = sand.u32 1, %s1363_s12   ;;  %p1040_p3 = pnand %p998_p9, %p1456_p12 }
  0xd2   : > { %s880_s10 = scalar_lea.sflag [#allocation4], %s879_s26 }
  0xd3   : > { %p1041_p4 = pneg %p1040_p3 }
  0xd5   : > { %1354 = dma.done.wait (%p1041_p4), %s880_s10, 4096  }
  0xd6   : > { %1356 = vsyncadd (%p1041_p4), %s880_s10, 4294963200  ;;  %s890_s11 = scalar_lea.sflag [#allocation9], %s879_s26 }
  0xd7   : > { %1358 = dma.done.wait (%p1041_p4), %s890_s11, 4096  }
  0xd8   : > { %1360 = vsyncadd (%p1041_p4), %s890_s11, 4294963200  ;;  %s2275_s24 = sld [smem:[#allocation14_spill]]  ;;  %p23_p11 = scmp.ge.s32.totalorder %s1427_s18, 4  }
  0xd9   : > { %s2276_s12 = smov %s1367_s13  ;;  %s2277_s13 = smov %s1371_s14 }
  0xda   : > { %s2279_s15 = smov %s1427_s18  ;;  %25 = sbr.rel (!%p23_p11) target bundleno = 11 (0xb), region = 103 }
  0xde   : > { %s2278_s14 = smov %s2275_s24 }
  0xdf   :  { %896 = vsyncpa [#allocation3], 1 }
  0xe0   :  { %898 = vsyncpa [#allocation3 + $0x1], 1 }
  0xe1   :  { %899 = vsyncpa [#allocation6], 1 }
  0xe2   :  { %901 = vsyncpa [#allocation6 + $0x1], 1 }
  0xe3   :  { %902 = vsyncpa [#allocation4], 1 }
  0xe4   :  { %904 = vsyncpa [#allocation4 + $0x1], 1 }
  0xe5   :  { %905 = vsyncpa [#allocation9], 1 }
  0xe6   :  { %907 = vsyncpa [#allocation9 + $0x1], 1 }

</bundles_post_ra>
